<compile_context>
chip_gen: v6e
topology: v6e:2x2x1
jax: 0.10.0
libtpu: 0.0.40
codegen_flags: <defaults>
</compile_context>

<pallas_src>
import functools

import jax
import jax.numpy as jnp
from jax import lax
from jax.experimental import pallas as pl
from jax.experimental.pallas import tpu as pltpu

_EPS = 1e-5
_VMEM_CAP = 48 * 1024 * 1024  # sized for v7x's 64 MiB physical VMEM


# ----------------------------- Pallas kernels ------------------------------ #
def _conv_stats_kernel(xph_ref, w_ref, y_ref, ssum_ref, ssq_ref, *, taps, lout):
    # Stage A: conv1 as shifted matmuls on the phase-split padded input.
    # xph_ref: (S, Cin, Lph) bf16   w_ref: (K, Cout, Cin) bf16
    # y_ref:   (Cout, Lout) f32 pre-BN output for this sample
    # ssum/ssq: (Cout, 1) f32 accumulators resident across the batch grid.
    n = pl.program_id(0)

    acc = jnp.zeros(y_ref.shape, jnp.float32)
    for k, r, off in taps:                       # static unrolled taps
        acc = acc + jnp.dot(w_ref[k], xph_ref[r, :, off:off + lout],
                            preferred_element_type=jnp.float32)
    y_ref[...] = acc

    @pl.when(n == 0)
    def _():
        ssum_ref[...] = jnp.zeros_like(ssum_ref)
        ssq_ref[...] = jnp.zeros_like(ssq_ref)

    ssum_ref[...] += jnp.sum(acc, axis=1, keepdims=True)
    ssq_ref[...] += jnp.sum(acc * acc, axis=1, keepdims=True)


def _mid_kernel(*refs, l1, ds_tap, downsample, cdtype):
    # Stage B: bn1-apply + relu + conv2(stride 1) + bn2 stats + shortcut path.
    if downsample:
        (y1_ref, xph_ref, sc1_ref, sh1_ref, w2_ref, wd_ref,
         y2_ref, ds_ref, sum2_ref, sq2_ref, sumd_ref, sqd_ref, hpad_ref) = refs
    else:
        (y1_ref, xph_ref, sc1_ref, sh1_ref, w2_ref,
         y2_ref, ds_ref, sum2_ref, sq2_ref, hpad_ref) = refs

    n = pl.program_id(0)

    @pl.when(n == 0)
    def _():
        hpad_ref[...] = jnp.zeros_like(hpad_ref)   # edge columns stay zero
        sum2_ref[...] = jnp.zeros_like(sum2_ref)
        sq2_ref[...] = jnp.zeros_like(sq2_ref)
        if downsample:
            sumd_ref[...] = jnp.zeros_like(sumd_ref)
            sqd_ref[...] = jnp.zeros_like(sqd_ref)

    # bn1 folded scale/shift + relu (one multiply-add + max per element).
    h = jnp.maximum(y1_ref[...] * sc1_ref[...] + sh1_ref[...], 0.0)
    hpad_ref[:, 1:l1 + 1] = h.astype(cdtype)

    # conv2 (k=3, stride 1) as three shifted matmuls off the padded scratch.
    acc = jnp.zeros(y2_ref.shape, jnp.float32)
    for k in range(3):
        acc = acc + jnp.dot(w2_ref[k], hpad_ref[:, k:k + l1],
                            preferred_element_type=jnp.float32)
    y2_ref[...] = acc
    sum2_ref[...] += jnp.sum(acc, axis=1, keepdims=True)
    sq2_ref[...] += jnp.sum(acc * acc, axis=1, keepdims=True)

    # shortcut path (strided slice taken directly from the phase tensor).
    r, off = ds_tap
    if downsample:
        xs = xph_ref[r, :, off:off + l1]                       # (Cin, L1) bf16
        dsv = jnp.dot(wd_ref[...], xs, preferred_element_type=jnp.float32)
        ds_ref[...] = dsv
        sumd_ref[...] += jnp.sum(dsv, axis=1, keepdims=True)
        sqd_ref[...] += jnp.sum(dsv * dsv, axis=1, keepdims=True)
    else:
        # identity shortcut: no eye() matmul, just pass x through.
        ds_ref[...] = xph_ref[r, :, off:off + l1].astype(jnp.float32)


def _finalize_kernel(*refs, downsample):
    # Stage C: bn2 (+ bnd) apply + residual add + relu.  Purely elementwise.
    if downsample:
        y2_ref, ds_ref, sc2_ref, sh2_ref, scd_ref, shd_ref, out_ref = refs
    else:
        y2_ref, ds_ref, sc2_ref, sh2_ref, out_ref = refs
    y = y2_ref[...] * sc2_ref[...] + sh2_ref[...]
    d = ds_ref[...]
    if downsample:
        d = d * scd_ref[...] + shd_ref[...]
    out_ref[...] = jnp.maximum(y + d, 0.0).astype(out_ref.dtype)


# ------------------------------ JAX glue ----------------------------------- #
def _phase_split(x, ksize, stride, pad, dtype):
    # (N, C, L) -> (N, stride, C, Lph): phases of the zero-padded input.
    # Total data = 1x the input (pure de-interleave, no K-fold duplication).
    n, c, l = x.shape
    xp = jnp.pad(x, ((0, 0), (0, 0), (pad, pad)))
    lp = l + 2 * pad
    lout = (lp - ksize) // stride + 1
    lph = lout + (ksize - 1) // stride
    phases = []
    for r in range(stride):
        ph = lax.slice_in_dim(xp, r, lp, stride=stride, axis=2)
        cur = ph.shape[-1]
        if cur < lph:
            ph = jnp.pad(ph, ((0, 0), (0, 0), (0, lph - cur)))
        else:
            ph = ph[:, :, :lph]
        phases.append(ph)
    return jnp.stack(phases, axis=1).astype(dtype), lout


def _bn_fold(ssum, ssq, gamma, beta, count):
    # One-pass batch stats -> single per-channel scale / shift (f32).
    mean = ssum / count
    var = jnp.maximum(ssq / count - mean * mean, 0.0)
    scale = gamma[:, None] * lax.rsqrt(var + _EPS)
    shift = beta[:, None] - mean * scale
    return scale, shift


def resblk_pallas(x, params, stride, compute_dtype=jnp.bfloat16):
    s1, s2 = stride
    n, cin, l = x.shape
    w1 = params["w1"]
    cout = w1.shape[0]
    downsample = (cout != cin)
    f32 = jnp.float32

    if s2 != 1:
        raise NotImplementedError("conv2 stride != 1 not supported")
    if not downsample and s1 != 1:
        # PyTorch identity shortcut only shape-checks when stride[0] == 1.
        raise ValueError("identity shortcut requires stride[0] == 1")

    xph, l1 = _phase_split(x, 3, s1, 1, compute_dtype)   # (N, s1, Cin, Lph)
    lph = xph.shape[-1]
    w1t = jnp.transpose(w1, (2, 0, 1)).astype(compute_dtype)       # (3,Cout,Cin)
    taps1 = tuple((k, k % s1, k // s1) for k in range(3))

    # ---------------- stage A: conv1 + bn1 batch-stat accumulation ----------
    y1, sum1, sq1 = pl.pallas_call(
        functools.partial(_conv_stats_kernel, taps=taps1, lout=l1),
        grid=(n,),
        in_specs=[
            pl.BlockSpec((None, s1, cin, lph), lambda i: (i, 0, 0, 0)),
            pl.BlockSpec((3, cout, cin), lambda i: (0, 0, 0)),
        ],
        out_specs=(
            pl.BlockSpec((None, cout, l1), lambda i: (i, 0, 0)),
            pl.BlockSpec((cout, 1), lambda i: (0, 0)),
            pl.BlockSpec((cout, 1), lambda i: (0, 0)),
        ),
        out_shape=(
            jax.ShapeDtypeStruct((n, cout, l1), f32),
            jax.ShapeDtypeStruct((cout, 1), f32),
            jax.ShapeDtypeStruct((cout, 1), f32),
        ),
        compiler_params=pltpu.CompilerParams(
            dimension_semantics=("arbitrary",), vmem_limit_bytes=_VMEM_CAP),
        cost_estimate=pl.CostEstimate(
            flops=2 * cout * cin * 3 * n * l1,
            transcendentals=0,
            bytes_accessed=n * s1 * cin * lph * 2 + 3 * cout * cin * 2
                           + n * cout * l1 * 4 + 2 * cout * 4),
    )(xph, w1t)

    sc1, sh1 = _bn_fold(sum1, sq1, params["bn1_gamma"], params["bn1_beta"],
                        n * l1)

    # ---------------- stage B: bn1+relu+conv2+bn2 stats + shortcut ----------
    w2t = jnp.transpose(params["w2"], (2, 0, 1)).astype(compute_dtype)
    ds_tap = (1 % s1, 1 // s1)   # xpad offset "pad" == the un-shifted x samples

    in_arrays = [y1, xph, sc1, sh1, w2t]
    in_specs = [
        pl.BlockSpec((None, cout, l1), lambda i: (i, 0, 0)),
        pl.BlockSpec((None, s1, cin, lph), lambda i: (i, 0, 0, 0)),
        pl.BlockSpec((cout, 1), lambda i: (0, 0)),
        pl.BlockSpec((cout, 1), lambda i: (0, 0)),
        pl.BlockSpec((3, cout, cout), lambda i: (0, 0, 0)),
    ]
    out_shape = [
        jax.ShapeDtypeStruct((n, cout, l1), f32),   # conv2 pre-BN
        jax.ShapeDtypeStruct((n, cout, l1), f32),   # shortcut pre-BN / identity
        jax.ShapeDtypeStruct((cout, 1), f32),
        jax.ShapeDtypeStruct((cout, 1), f32),
    ]
    out_specs = [
        pl.BlockSpec((None, cout, l1), lambda i: (i, 0, 0)),
        pl.BlockSpec((None, cout, l1), lambda i: (i, 0, 0)),
        pl.BlockSpec((cout, 1), lambda i: (0, 0)),
        pl.BlockSpec((cout, 1), lambda i: (0, 0)),
    ]
    if downsample:
        wd = params["wd"][:, :, 0].astype(compute_dtype)           # (Cout, Cin)
        in_arrays.append(wd)
        in_specs.append(pl.BlockSpec((cout, cin), lambda i: (0, 0)))
        out_shape += [jax.ShapeDtypeStruct((cout, 1), f32),
                      jax.ShapeDtypeStruct((cout, 1), f32)]
        out_specs += [pl.BlockSpec((cout, 1), lambda i: (0, 0)),
                      pl.BlockSpec((cout, 1), lambda i: (0, 0))]

    flops_b = 2 * cout * cout * 3 * n * l1 \
        + (2 * cout * cin * n * l1 if downsample else 0) + 4 * n * cout * l1
    results = pl.pallas_call(
        functools.partial(_mid_kernel, l1=l1, ds_tap=ds_tap,
                          downsample=downsample, cdtype=compute_dtype),
        grid=(n,),
        in_specs=in_specs,
        out_specs=tuple(out_specs),
        out_shape=tuple(out_shape),
        scratch_shapes=[pltpu.VMEM((cout, l1 + 2), compute_dtype)],
        compiler_params=pltpu.CompilerParams(
            dimension_semantics=("arbitrary",), vmem_limit_bytes=_VMEM_CAP),
        cost_estimate=pl.CostEstimate(
            flops=flops_b, transcendentals=0,
            bytes_accessed=3 * n * cout * l1 * 4 + n * s1 * cin * lph * 2
                           + 3 * cout * cout * 2 + 4 * cout * 4),
    )(*in_arrays)

    if downsample:
        y2, dsv, sum2, sq2, sumd, sqd = results
    else:
        y2, dsv, sum2, sq2 = results

    sc2, sh2 = _bn_fold(sum2, sq2, params["bn2_gamma"], params["bn2_beta"],
                        n * l1)

    # ---------------- stage C: bn apply + add + relu (parallel grid) --------
    fin_arrays = [y2, dsv, sc2, sh2]
    fin_specs = [
        pl.BlockSpec((None, cout, l1), lambda i: (i, 0, 0)),
        pl.BlockSpec((None, cout, l1), lambda i: (i, 0, 0)),
        pl.BlockSpec((cout, 1), lambda i: (0, 0)),
        pl.BlockSpec((cout, 1), lambda i: (0, 0)),
    ]
    if downsample:
        scd, shd = _bn_fold(sumd, sqd, params["bnd_gamma"], params["bnd_beta"],
                            n * l1)
        fin_arrays += [scd, shd]
        fin_specs += [pl.BlockSpec((cout, 1), lambda i: (0, 0)),
                      pl.BlockSpec((cout, 1), lambda i: (0, 0))]

    out = pl.pallas_call(
        functools.partial(_finalize_kernel, downsample=downsample),
        grid=(n,),
        in_specs=fin_specs,
        out_specs=pl.BlockSpec((None, cout, l1), lambda i: (i, 0, 0)),
        out_shape=jax.ShapeDtypeStruct((n, cout, l1), f32),
        compiler_params=pltpu.CompilerParams(
            dimension_semantics=("parallel",), vmem_limit_bytes=_VMEM_CAP),
        cost_estimate=pl.CostEstimate(
            flops=5 * n * cout * l1, transcendentals=0,
            bytes_accessed=3 * n * cout * l1 * 4),
    )(*fin_arrays)

    return out                                    # (N, Cout, L2), float32


# -------------------------- pure-JAX reference ------------------------------ #
def _conv1d_ref(x, w, stride, pad, cdtype):
    # Conv operands cast to the same MXU compute dtype as the Pallas path,
    # accumulation in f32 (mirrors MXU bf16 matmul semantics).
    return lax.conv_general_dilated(
        x.astype(cdtype), w.astype(cdtype), window_strides=(stride,),
        padding=[(pad, pad)], dimension_numbers=("NCH", "OIH", "NCH"),
        preferred_element_type=jnp.float32)


def _bn_train_ref(y, gamma, beta):
    mean = y.mean(axis=(0, 2), keepdims=True)
    var = ((y - mean) ** 2).mean(axis=(0, 2), keepdims=True)
    return (y - mean) / jnp.sqrt(var + _EPS) * gamma[None, :, None] \
        + beta[None, :, None]


def resblk_reference(x, params, stride, compute_dtype=jnp.bfloat16):
    out = _conv1d_ref(x, params["w1"], stride[0], 1, compute_dtype)
    out = jnp.maximum(
        _bn_train_ref(out, params["bn1_gamma"], params["bn1_beta"]), 0.0)
    out = _conv1d_ref(out, params["w2"], stride[1], 1, compute_dtype)
    out = _bn_train_ref(out, params["bn2_gamma"], params["bn2_beta"])
    if params["w1"].shape[0] != x.shape[1]:
        ds = _conv1d_ref(x, params["wd"], stride[0], 0, compute_dtype)
        ds = _bn_train_ref(ds, params["bnd_gamma"], params["bnd_beta"])
    else:
        ds = x.astype(compute_dtype).astype(jnp.float32)
    return jnp.maximum(ds + out, 0.0)


# ---------------------------------- main ------------------------------------ #
def _make_params(keys, cin, cout, downsample):
    p = {
        "w1": jax.random.normal(keys[0], (cout, cin, 3), jnp.float32) * 0.3,
        "bn1_gamma": 0.5 + jax.random.uniform(keys[1], (cout,), jnp.float32),
        "bn1_beta": jax.random.normal(keys[2], (cout,), jnp.float32) * 0.1,
        "w2": jax.random.normal(keys[3], (cout, cout, 3), jnp.float32) * 0.3,
        "bn2_gamma": 0.5 + jax.random.uniform(keys[4], (cout,), jnp.float32),
        "bn2_beta": jax.random.normal(keys[5], (cout,), jnp.float32) * 0.1,
    }
    if downsample:
        p["wd"] = jax.random.normal(keys[6], (cout, cin, 1), jnp.float32) * 0.3
        p["bnd_gamma"] = 0.5 + jax.random.uniform(keys[7], (cout,), jnp.float32)
        p["bnd_beta"] = jax.random.normal(keys[8], (cout,), jnp.float32) * 0.1
    return p


def _check(name, out, ref):
    assert out.shape == ref.shape, (name, out.shape, ref.shape)
    if not bool(jnp.allclose(out, ref, atol=1e-2, rtol=1e-2)):
        err = float(jnp.max(jnp.abs(out - ref)))
        raise AssertionError(f"{name}: Pallas ResBlk mismatch, max abs err {err}")


if __name__ == "__main__":
    key = jax.random.PRNGKey(0)
    ks = jax.random.split(key, 20)

    # config 1: channel-doubling block, stride=(2,1), downsample path active
    N, Cin, Cout, L = 2, 4, 8, 16
    x1 = jax.random.normal(ks[0], (N, Cin, L), jnp.float32)
    p1 = _make_params(ks[1:10], Cin, Cout, True)
    out1 = jax.block_until_ready(resblk_pallas(x1, p1, (2, 1)))
    _check("downsample block", out1, resblk_reference(x1, p1, (2, 1)))

    # config 2: identity shortcut, stride=(1,1), cin == cout
    x2 = jax.random.normal(ks[10], (N, Cout, L), jnp.float32)
    p2 = _make_params(ks[11:17], Cout, Cout, False)
    out2 = jax.block_until_ready(resblk_pallas(x2, p2, (1, 1)))
    _check("identity block", out2, resblk_reference(x2, p2, (1, 1)))

    print("KERNEL_OK")
</pallas_src>

<mosaic_0001>
module attributes {stable_mosaic.version = 11 : i64} {
  func.func @_conv_stats_kernel(%arg0: i32, %arg1: memref<1x2x4x9xbf16, #tpu.memory_space<vmem>>, %arg2: memref<3x8x4xbf16, #tpu.memory_space<vmem>>, %arg3: memref<1x8x8xf32, #tpu.memory_space<vmem>>, %arg4: memref<8x1xf32, #tpu.memory_space<vmem>>, %arg5: memref<8x1xf32, #tpu.memory_space<vmem>>) attributes {dimension_semantics = [#tpu.dimension_semantics<arbitrary>], iteration_bounds = array<i64: 2>, scalar_prefetch = 0 : i64, scratch_operands = 0 : i64, tpu.core_type = #tpu.core_type<tc>, window_params = [{transform_indices = @transform_0, window_bounds = array<i64: 1, 2, 4, 9>}, {pipeline_mode = #tpu.pipeline_mode<synchronous>, transform_indices = @transform_1, window_bounds = array<i64: 3, 8, 4>}, {transform_indices = @transform_2, window_bounds = array<i64: 1, 8, 8>}, {pipeline_mode = #tpu.pipeline_mode<synchronous>, transform_indices = @transform_3, window_bounds = array<i64: 8, 1>}, {pipeline_mode = #tpu.pipeline_mode<synchronous>, transform_indices = @transform_4, window_bounds = array<i64: 8, 1>}]} {
    %cst = arith.constant 0.000000e+00 : f32
    %0 = vector.broadcast %cst : f32 to vector<8x8xf32>
    %c0 = arith.constant 0 : index
    %c0_0 = arith.constant 0 : index
    %c0_1 = arith.constant 0 : index
    %1 = vector.load %arg2[%c0, %c0_0, %c0_1] : memref<3x8x4xbf16, #tpu.memory_space<vmem>>, vector<1x8x4xbf16>
    %2 = vector.shape_cast %1 : vector<1x8x4xbf16> to vector<8x4xbf16>
    %c0_2 = arith.constant 0 : index
    %c0_3 = arith.constant 0 : index
    %c0_4 = arith.constant 0 : index
    %c0_5 = arith.constant 0 : index
    %3 = vector.load %arg1[%c0_2, %c0_3, %c0_4, %c0_5] : memref<1x2x4x9xbf16, #tpu.memory_space<vmem>>, vector<1x1x4x8xbf16>
    %4 = vector.shape_cast %3 : vector<1x1x4x8xbf16> to vector<4x8xbf16>
    %cst_6 = arith.constant dense<0.000000e+00> : vector<8x8xf32>
    %5 = tpu.matmul %2, %4, %cst_6 {dimension_numbers = #tpu.dot_dimension_numbers<[1], [0], [0], [1], [0, 0, 1, 1], [], []>} : vector<8x4xbf16>, vector<4x8xbf16>, vector<8x8xf32> -> vector<8x8xf32>
    %6 = arith.addf %0, %5 : vector<8x8xf32>
    %c1 = arith.constant 1 : index
    %c0_7 = arith.constant 0 : index
    %c0_8 = arith.constant 0 : index
    %7 = vector.load %arg2[%c1, %c0_7, %c0_8] : memref<3x8x4xbf16, #tpu.memory_space<vmem>>, vector<1x8x4xbf16>
    %8 = vector.shape_cast %7 : vector<1x8x4xbf16> to vector<8x4xbf16>
    %c0_9 = arith.constant 0 : index
    %c1_10 = arith.constant 1 : index
    %c0_11 = arith.constant 0 : index
    %c0_12 = arith.constant 0 : index
    %9 = vector.load %arg1[%c0_9, %c1_10, %c0_11, %c0_12] : memref<1x2x4x9xbf16, #tpu.memory_space<vmem>>, vector<1x1x4x8xbf16>
    %10 = vector.shape_cast %9 : vector<1x1x4x8xbf16> to vector<4x8xbf16>
    %cst_13 = arith.constant dense<0.000000e+00> : vector<8x8xf32>
    %11 = tpu.matmul %8, %10, %cst_13 {dimension_numbers = #tpu.dot_dimension_numbers<[1], [0], [0], [1], [0, 0, 1, 1], [], []>} : vector<8x4xbf16>, vector<4x8xbf16>, vector<8x8xf32> -> vector<8x8xf32>
    %12 = arith.addf %6, %11 : vector<8x8xf32>
    %c2 = arith.constant 2 : index
    %c0_14 = arith.constant 0 : index
    %c0_15 = arith.constant 0 : index
    %13 = vector.load %arg2[%c2, %c0_14, %c0_15] : memref<3x8x4xbf16, #tpu.memory_space<vmem>>, vector<1x8x4xbf16>
    %14 = vector.shape_cast %13 : vector<1x8x4xbf16> to vector<8x4xbf16>
    %c0_16 = arith.constant 0 : index
    %c0_17 = arith.constant 0 : index
    %c0_18 = arith.constant 0 : index
    %c1_19 = arith.constant 1 : index
    %15 = vector.load %arg1[%c0_16, %c0_17, %c0_18, %c1_19] : memref<1x2x4x9xbf16, #tpu.memory_space<vmem>>, vector<1x1x4x8xbf16>
    %16 = vector.shape_cast %15 : vector<1x1x4x8xbf16> to vector<4x8xbf16>
    %cst_20 = arith.constant dense<0.000000e+00> : vector<8x8xf32>
    %17 = tpu.matmul %14, %16, %cst_20 {dimension_numbers = #tpu.dot_dimension_numbers<[1], [0], [0], [1], [0, 0, 1, 1], [], []>} : vector<8x4xbf16>, vector<4x8xbf16>, vector<8x8xf32> -> vector<8x8xf32>
    %18 = arith.addf %12, %17 : vector<8x8xf32>
    %c0_21 = arith.constant 0 : index
    %c0_22 = arith.constant 0 : index
    %c0_23 = arith.constant 0 : index
    %19 = vector.load %arg3[%c0_21, %c0_22, %c0_23] : memref<1x8x8xf32, #tpu.memory_space<vmem>>, vector<1x8x8xf32>
    %20 = vector.shape_cast %19 : vector<1x8x8xf32> to vector<8x8xf32>
    %21 = vector.shape_cast %18 : vector<8x8xf32> to vector<1x8x8xf32>
    tpu.vector_store %arg3[%c0_21, %c0_22, %c0_23], %21 {strides = array<i32>} : memref<1x8x8xf32, #tpu.memory_space<vmem>>, vector<1x8x8xf32>,
    %c0_i32 = arith.constant 0 : i32
    %22 = arith.cmpi eq, %arg0, %c0_i32 : i32
    %23 = arith.extui %22 : i1 to i32
    %c0_i32_24 = arith.constant 0 : i32
    %24 = arith.cmpi ne, %23, %c0_i32_24 : i32
    scf.if %24 {
      %cst_35 = arith.constant 0.000000e+00 : f32
      %36 = vector.broadcast %cst_35 : f32 to vector<8x1xf32>
      %c0_36 = arith.constant 0 : index
      %c0_37 = arith.constant 0 : index
      %37 = vector.load %arg4[%c0_36, %c0_37] : memref<8x1xf32, #tpu.memory_space<vmem>>, vector<8x1xf32>
      tpu.vector_store %arg4[%c0_36, %c0_37], %36 {strides = array<i32>} : memref<8x1xf32, #tpu.memory_space<vmem>>, vector<8x1xf32>,
      %cst_38 = arith.constant 0.000000e+00 : f32
      %38 = vector.broadcast %cst_38 : f32 to vector<8x1xf32>
      %c0_39 = arith.constant 0 : index
      %c0_40 = arith.constant 0 : index
      %39 = vector.load %arg5[%c0_39, %c0_40] : memref<8x1xf32, #tpu.memory_space<vmem>>, vector<8x1xf32>
      tpu.vector_store %arg5[%c0_39, %c0_40], %38 {strides = array<i32>} : memref<8x1xf32, #tpu.memory_space<vmem>>, vector<8x1xf32>,
    } else {
    }
    %c0_25 = arith.constant 0 : index
    %c0_26 = arith.constant 0 : index
    %25 = vector.load %arg4[%c0_25, %c0_26] : memref<8x1xf32, #tpu.memory_space<vmem>>, vector<8x1xf32>
    %cst_27 = arith.constant dense<0.000000e+00> : vector<8xf32>
    %26 = vector.multi_reduction <add>, %18, %cst_27 [1] : vector<8x8xf32> to vector<8xf32>
    %27 = vector.shape_cast %26 : vector<8xf32> to vector<8x1xf32>
    %28 = arith.addf %25, %27 : vector<8x1xf32>
    %c0_28 = arith.constant 0 : index
    %c0_29 = arith.constant 0 : index
    %29 = vector.load %arg4[%c0_28, %c0_29] : memref<8x1xf32, #tpu.memory_space<vmem>>, vector<8x1xf32>
    tpu.vector_store %arg4[%c0_28, %c0_29], %28 {strides = array<i32>} : memref<8x1xf32, #tpu.memory_space<vmem>>, vector<8x1xf32>,
    %c0_30 = arith.constant 0 : index
    %c0_31 = arith.constant 0 : index
    %30 = vector.load %arg5[%c0_30, %c0_31] : memref<8x1xf32, #tpu.memory_space<vmem>>, vector<8x1xf32>
    %31 = arith.mulf %18, %18 : vector<8x8xf32>
    %cst_32 = arith.constant dense<0.000000e+00> : vector<8xf32>
    %32 = vector.multi_reduction <add>, %31, %cst_32 [1] : vector<8x8xf32> to vector<8xf32>
    %33 = vector.shape_cast %32 : vector<8xf32> to vector<8x1xf32>
    %34 = arith.addf %30, %33 : vector<8x1xf32>
    %c0_33 = arith.constant 0 : index
    %c0_34 = arith.constant 0 : index
    %35 = vector.load %arg5[%c0_33, %c0_34] : memref<8x1xf32, #tpu.memory_space<vmem>>, vector<8x1xf32>
    tpu.vector_store %arg5[%c0_33, %c0_34], %34 {strides = array<i32>} : memref<8x1xf32, #tpu.memory_space<vmem>>, vector<8x1xf32>,
    return
  }
  func.func @transform_0(%arg0: i32) -> (i32, i32, i32, i32) {
    %c0_i32 = arith.constant 0 : i32
    %c0_i32_0 = arith.constant 0 : i32
    %c0_i32_1 = arith.constant 0 : i32
    %c0_i32_2 = arith.constant 0 : i32
    return %arg0, %c0_i32, %c0_i32_0, %c0_i32_1 : i32, i32, i32, i32
  }
  func.func @transform_1(%arg0: i32) -> (i32, i32, i32) {
    %c0_i32 = arith.constant 0 : i32
    %c0_i32_0 = arith.constant 0 : i32
    %c0_i32_1 = arith.constant 0 : i32
    %c0_i32_2 = arith.constant 0 : i32
    return %c0_i32, %c0_i32_0, %c0_i32_1 : i32, i32, i32
  }
  func.func @transform_2(%arg0: i32) -> (i32, i32, i32) {
    %c0_i32 = arith.constant 0 : i32
    %c0_i32_0 = arith.constant 0 : i32
    %c0_i32_1 = arith.constant 0 : i32
    return %arg0, %c0_i32, %c0_i32_0 : i32, i32, i32
  }
  func.func @transform_3(%arg0: i32) -> (i32, i32) {
    %c0_i32 = arith.constant 0 : i32
    %c0_i32_0 = arith.constant 0 : i32
    %c0_i32_1 = arith.constant 0 : i32
    return %c0_i32, %c0_i32_0 : i32, i32
  }
  func.func @transform_4(%arg0: i32) -> (i32, i32) {
    %c0_i32 = arith.constant 0 : i32
    %c0_i32_0 = arith.constant 0 : i32
    %c0_i32_1 = arith.constant 0 : i32
    return %c0_i32, %c0_i32_0 : i32, i32
  }
}

</mosaic_0001>

<bundles_post_ra>
// kernel: tpu_custom_call.1
= control target key start
LH: loop header
LB: loop body
LE: loop exit
PB: predicated region body
PF: predicated region fallthrough
CT: control target
= control target key end

     0   :  { %10 = vsyncpa [#allocation3], 0  ;;  %s763_s0 = inlined_call_operand.vmem [shape: bf16[2,2,4,9], index: 0, kind: input, shape index: {}]   ;;  %s764_s1 = inlined_call_operand.vmem [shape: bf16[3,8,4], index: 1, kind: input, shape index: {}]   ;;  %s765_s2 = inlined_call_operand.hbm [shape: f32[2,8,8], index: 2, kind: output, shape index: {0}]   ;;  %s766_s3 = inlined_call_operand.vmem [shape: f32[8,1], index: 3, kind: output, shape index: {1}]   ;;  %s767_s4 = inlined_call_operand.vmem [shape: f32[8,1], index: 4, kind: output, shape index: {2}]  }
   0x1   :  { %12 = vsyncpa [#allocation3 + $0x1], 0  ;;  %s639_s15 = smov 0   ;;  %s641_s16 = smov 0  }
   0x2   :  { %s643_s17 = smov 0   ;;  %s645_s18 = smov 0  }
   0x3 LB: > { %s660_s19 = sadd.s32 4294967295, %s606_s18   ;;  %s459_s20 = sadd.s32 4294967294, %s606_s18   ;;  %s606_s18 = sphi %s645_s18, %s773_s18   ;;  %s602_s17 = sphi %s643_s17, %s772_s17   ;;  %s598_s16 = sphi %s641_s16, %s771_s16   ;;  %s594_s15 = sphi %s639_s15, %s770_s15  }
   0x4   : > { %s664_s21 = sadd.s32 1, %s606_s18   ;;  %s72_s22 = sadd.s32 1, %s602_s17 }
   0x5   : > { %s69_s23 = ssub.s32 %s606_s18, %s664_s21  ;;  %p82_p0 = scmp.ne.s32.totalorder %s602_s17, %s598_s16 }
   0x6   : > { %p70_p1 = scmp.eq.s32.totalorder %s69_s23, 0  ;;  %p83_p2 = scmp.eq.s32.totalorder %s660_s19, 1 }
   0x7   : > { %p88_p3 = scmp.ne.s32.totalorder %s598_s16, %s594_s15  ;;  %p89_p4 = scmp.eq.s32.totalorder %s459_s20, 1 }
   0x8   : > { %s675_s24 = scalar_select %p70_p1, %s602_s17, %s72_s22  }
   0x9   : > { %p677_p5 = por %p83_p2, %p82_p0  ;;  %p681_p6 = por %p89_p4, %p88_p3 }
   0xa   : > { %p462_p7 = scmp.ge.s32.totalorder %s606_s18, 1  ;;  %p160_p8 = scmp.lt.s32.totalorder %s606_s18, 3 }
   0xc   : > { %p161_p9 = pnand %p462_p7, %p160_p8 }
   0xd   : > { %p186_p10 = scmp.lt.s32.totalorder (!%p161_p9), %s660_s19, 1  ;;  %s611_s10 = smov (!%p161_p9), 127  }
   0xe   : > { %164 = sbr.rel (%p161_p9) target bundleno = 494 (0x1ee), region = 28  ;;  %s179_s13 = sand.u32 (!%p161_p9), 1, %s598_s16  }
   0xf   : > { %s463_s14 = sshll.u32 (!%p161_p9), %s179_s13, 3  ;;  %p472_p11 = scmp.ne.s32.totalorder (!%p161_p9), %s660_s19, 0 }
  0x10   : > { %s181_s20 = scalar_lea.vmem (!%p161_p9), [#allocation2], %s463_s14 }
  0x13   : > { %v298_v0 = vlaneseq  ;;  %v608_v1 = vmov 1983009808   ;;  %v609_v3 = vmov 0.0   ;;  %s187_s27 = scalar_select %p186_p10, %s660_s19, 1  ;;  %vm610_vm0 = vmmov 0  }
  0x14   : > { %v296_v2 = vunpack.c.l.s4 %v608_v1  ;;  %484 = vmatprep.subr.bf16.mxu0 %v609_v3  ;;  %490 = vmatprep.subr.bf16.mxu1 %v609_v3  ;;  %vm202_vm1 = vcmask 1041408   ;;  %v466_v12 = vld [vmem:[%s764_s1 + $0x4] sm:$0xf]  ;;  %vm198_vm2 = vcmask 31744   ;;  %v192_v13 = vld [vmem:[%s764_s1] sm:$0xf] }
  0x15   : > { %v299_v4 = vshrl.u32 %v298_v0, 7  ;;  %486 = vmatprep.mubr.msk.bf16.mxu0 %vm610_vm0, %v609_v3  ;;  %492 = vmatprep.mubr.msk.bf16.mxu1 %vm610_vm0, %v609_v3  ;;  %s477_s28 = sshll.u32 %s187_s27, 2  ;;  %v470_v16 = vld [vmem:[%s764_s1 + $0x8] sm:$0xf]  ;;  %vm351_vm3 = vcmask 64512  }
  0x16   : > { %v297_v5 = vunpack.c.0.s8 %v296_v2  ;;  %s190_s5 = scalar_lea.vmem %s763_s0, %s477_s28 }
  0x17   : > { %v193_v7 = vld [vmem:[%s190_s5] sm:$0x3]  ;;  %v467_v8 = vld [vmem:[%s190_s5 + $0x2] sm:$0x3] }
  0x18   : > { %v300_v6 = vsub.s32 %v297_v5, %v299_v4  ;;  %v204_v10 = vsel %vm202_vm1, %v467_v8, 0  ;;  %v250_v11 = vsel %vm202_vm1, %v193_v7, 0 }
  0x19   : > { %485 = vmatpush3.bf16.msra.mxu0 %v204_v10  ;;  %491 = vmatpush3.bf16.msra.mxu1 %v250_v11 }
  0x1a   : > { %v301_v9 = vrot.slane %v193_v7, %v300_v6  ;;  %496 = vmatprep.subr.bf16.mxu0 %v609_v3 }
  0x1c   : > { %302 = vrot.lane.b32.xlu0 %v301_v9, %s611_s10  ;;  %487 = vmatmul.mubr.msk.bf16.vlgmr.msra.gmra.mxu0 %vm198_vm2, %v466_v12 }
  0x1d   : > { %493 = vmatmul.mubr.msk.bf16.vlgmr.msra.gmra.mxu1 %vm198_vm2, %v192_v13  ;;  %498 = vmatprep.mubr.msk.bf16.mxu0 %vm610_vm0, %v609_v3 }
  0x8e   : > { %v303_v14 = vpop.permute.xlu0 %302 }
  0x8f   : > { %v308_v15 = vsel %vm202_vm1, %v303_v14, 0 }
  0x90   : > { %497 = vmatpush3.bf16.msra.mxu0 %v308_v15 }
  0x93   : > { %499 = vmatmul.mubr.msk.bf16.vlgmr.msra.gmra.mxu0 %vm198_vm2, %v470_v16 }
  0xdc   : > { %v240_v17 = vpop.f32.mrf.mxu0 }
  0xdd   : > { %v286_v18 = vpop.f32.mrf.mxu1 }
  0xde   : > { %v287_v19 = vadd.f32 %v286_v18, %v240_v17  ;;  %v488_v20 = vpop.f32.mrf.mxu0 }
  0xdf   : > { %v494_v21 = vpop.f32.mrf.mxu1 }
  0xe0   : > { %v243_v22 = vpop.f32.mrf.mxu0 }
  0xe1   : > { %v289_v23 = vpop.f32.mrf.mxu1 }
  0xe2   : > { %v489_v24 = vpop.f32.mrf.mxu0 }
  0xe3   : > { %v495_v25 = vpop.f32.mrf.mxu1 }
 0x153   : > { %v344_v26 = vpop.f32.mrf.mxu0 }
 0x154   : > { %v350_v27 = vadd.f32 %v344_v26, %v287_v19 }
 0x155   : > { %v500_v28 = vpop.f32.mrf.mxu0  ;;  %356 = sbr.rel (%p472_p11) target bundleno = 348 (0x15c), region = 32 }
 0x156   : > { %352 = vst.msk [vmem:[%s181_s20] sm:$0xff] %vm351_vm3, %v350_v27 }
 0x157   : > { %v347_v29 = vpop.f32.mrf.mxu0 }
 0x159   : > { %v501_v30 = vpop.f32.mrf.mxu0 }
 0x15a   : > { %vm357_vm4 = vcmask 7168   ;;  %v612_v31 = vmov 0.0  }
 0x15b   : > { %358 = vst.msk [vmem:[%s766_s3] sm:$0xff] %vm357_vm4, %v612_v31  ;;  %359 = vst.msk [vmem:[%s767_s4] sm:$0xff] %vm357_vm4, %v612_v31 }
 0x15c PF: > { %v361_v32 = vsel %vm351_vm3, %v350_v27, 0.0  ;;  %v368_v33 = vmul.f32 %v350_v27, %v350_v27  ;;  %s474_s29 = sshll.u32 %s660_s19, 7  ;;  %s388_s30 = sshll.u32 %s181_s20, 4  ;;  %s389_s30 = int_to_ptr.vmem [resolvable:$true] %s388_s30 }
 0x15d   : > { %362 = vadd.xlane.f32.xlu0 %v361_v32  ;;  %s386_s7 = scalar_lea.hbm %s765_s2, %s474_s29  ;;  %s375_s8 = scalar_lea.sflag [#allocation3], %s179_s13 }
 0x15e   : > { %v369_v34 = vsel %vm351_vm3, %v368_v33, 0.0  ;;  %s546_s9 = scalar_lea.vmem %s389_s30, 128  ;;  %s613_s10 = smov [#allocation2]  }
 0x15f   : > { %p547_p12 = scmp.ne.s32.totalorder %s389_s30, %s546_s9  ;;  %s550_s11 = sshll.u32 %s613_s10, 4  ;;  %s551_s11 = int_to_ptr.vmem [resolvable:$false] %s550_s11 }
 0x160   : > { %s552_s12 = scalar_lea.vmem %s551_s11, 256  ;;  %p553_p1 = scmp.lt.s32.totalorder %s389_s30, %s551_s11 }
 0x161   : > { %370 = vadd.xlane.f32.xlu0 %v369_v34  ;;  %p548_p13 = pnand %p547_p12, %p677_p5  ;;  %p554_p2 = scmp.lt.s32.totalorder %s552_s12, %s546_s9 }
 0x163   : > { %p549_p0 = pneg %p548_p13  ;;  %p555_p3 = por %p554_p2, %p553_p1 }
 0x165   : > { %p556_p4 = pnand %p555_p3, %p549_p0 }
 0x167   : > { %559 = shalt.err (!%p556_p4)
}
 0x168   : > { %s560_s19 = scalar_lea.hbm %s386_s7, 128  ;;  %s564_s20 = scalar_lea.hbm %s765_s2, 256 }
 0x169   : > { %p561_p7 = scmp.ne.s32.totalorder %s386_s7, %s560_s19  ;;  %p565_p10 = scmp.lt.s32.totalorder %s386_s7, %s765_s2 }
 0x16a   : > { %p566_p11 = scmp.lt.s32.totalorder %s564_s20, %s560_s19 }
 0x16b   : > { %p562_p8 = pnand %p561_p7, %p677_p5 }
 0x16c   : > { %p567_p12 = por %p566_p11, %p565_p10 }
 0x16d   : > { %p563_p9 = pneg %p562_p8 }
 0x16f   : > { %p568_p13 = pnand %p567_p12, %p563_p9 }
 0x171   : > { %571 = shalt.err (!%p568_p13)
}
 0x172   : > { %502 = dma.vmem_to_hbm [thread:$0]  (%p677_p5), %s389_s30, 128, %s386_s7, %s375_s8   ;;  %v360_v35 = vld [vmem:[%s766_s3] sm:$0xff]  ;;  %vm365_vm5 = vcmask 7168  }
 0x173   : > { %v367_v38 = vld [vmem:[%s767_s4] sm:$0xff] }
 0x1e6   : > { %v363_v36 = vpop.xlane.xlu0 %362 }
 0x1e7   : > { %v364_v37 = vadd.f32 %v363_v36, %v360_v35 }
 0x1e9   : > { %366 = vst.msk [vmem:[%s766_s3] sm:$0xff] %vm365_vm5, %v364_v37 }
 0x1ea   : > { %v371_v39 = vpop.xlane.xlu0 %370 }
 0x1eb   : > { %v372_v40 = vadd.f32 %v371_v39, %v367_v38 }
 0x1ed   : > { %373 = vst.msk [vmem:[%s767_s4] sm:$0xff] %vm365_vm5, %v372_v40 }
 0x1ee PF: > { %p508_p5 = scmp.ge.s32.totalorder %s606_s18, 2  ;;  %s412_s30 = sand.u32 1, %s594_s15  }
 0x1ef   : > { %s413_s7 = scalar_lea.sflag [#allocation3], %s412_s30 }
 0x1f0   : > { %p505_p0 = pnand %p508_p5, %p681_p6 }
 0x1f2   : > { %p506_p1 = pneg %p505_p0 }
 0x1f4   : > { %589 = dma.done.wait (%p506_p1), %s413_s7, 128  }
 0x1f5   : > { %591 = vsyncadd (%p506_p1), %s413_s7, 4294967168  ;;  %p15_p2 = scmp.ge.s32.totalorder %s664_s21, 4   ;;  %s770_s15 = smov %s598_s16 }
 0x1f6   : > { %s771_s16 = smov %s602_s17  ;;  %s772_s17 = smov %s675_s24 }
 0x1f7   : > { %s773_s18 = smov %s664_s21  ;;  %17 = sbr.rel (!%p15_p2) target bundleno = 3 (0x3), region = 86 }
 0x1fc   :  { %418 = vsyncpa [#allocation3], 1 }
 0x1fd   :  { %420 = vsyncpa [#allocation3 + $0x1], 1 }

</bundles_post_ra>
